<compile_context>
chip_gen: v6e
topology: v6e:2x2x1
jax: 0.10.0
libtpu: 0.0.40
codegen_flags: <defaults>
</compile_context>

<pallas_src>
import jax
import jax.numpy as jnp
from jax.experimental import pallas as pl
from jax.experimental.pallas import tpu as pltpu


# --------------------------------------------------------------------------- #
# Small helpers (all trace-time Python, no device work).
# --------------------------------------------------------------------------- #
def _round_up(x: int, m: int) -> int:
    return (x + m - 1) // m * m


def _cdiv(a: int, b: int) -> int:
    return -(-a // b)


def _isz(dtype) -> int:
    return jnp.dtype(dtype).itemsize


def _choose_tile(dim: int, tile_max: int, align: int):
    """Pick a tile (multiple of `align`, ~<= tile_max) minimising the padded
    total size; tie-break toward the largest tile (fewest grid steps).
    Returns (tile, padded_dim)."""
    units = _cdiv(dim, align)
    max_units = max(1, tile_max // align)
    best = None  # (padded_units, n_blocks, units_per_block)
    for upb in range(min(units, max_units), 0, -1):
        nb = _cdiv(units, upb)
        cand = (nb * upb, nb, upb)
        if best is None or cand[:2] < best[:2]:
            best = cand
    return best[2] * align, best[0] * align


def _pad2d(a, rows: int, cols: int):
    pr, pc = rows - a.shape[0], cols - a.shape[1]
    if pr == 0 and pc == 0:
        return a
    return jnp.pad(a, ((0, pr), (0, pc)))


# --------------------------------------------------------------------------- #
# Kernel: one (i, j, k) grid step of silu(x @ W + b).
# --------------------------------------------------------------------------- #
def _linear_silu_kernel(x_ref, w_ref, b_ref, o_ref, *acc_scratch):
    """
    x_ref: (tm, tk)  activation tile
    w_ref: (tk, tn)  pre-transposed weight tile (K-major feed for the MXU)
    b_ref: (1,  tn)  bias tile
    o_ref: (tm, tn)  output tile (VMEM-resident across k; doubles as the f32
                     accumulator when no scratch is passed)
    acc_scratch: optional (tm, tn) f32 VMEM scratch for non-f32 outputs.
    """
    acc = acc_scratch[0] if acc_scratch else o_ref
    k = pl.program_id(2)

    # MXU matmul with f32 accumulation; no in-kernel transpose.
    p = jnp.dot(x_ref[...], w_ref[...], preferred_element_type=jnp.float32)

    @pl.when(k == 0)
    def _():
        acc[...] = p.astype(acc.dtype)          # store, no zero-fill + RMW

    @pl.when(k != 0)
    def _():
        acc[...] += p.astype(acc.dtype)

    @pl.when(k == pl.num_programs(2) - 1)
    def _():
        y = acc[...].astype(jnp.float32) + b_ref[...].astype(jnp.float32)
        y = y * (1.0 / (1.0 + jnp.exp(-y)))     # SiLU; exp runs on the EUP
        o_ref[...] = y.astype(o_ref.dtype)


# --------------------------------------------------------------------------- #
# One-time parameter preparation (do this at init time, NOT per forward call).
# --------------------------------------------------------------------------- #
def prepare_upsample_params(weight, bias, *, tn_max=512, tk_max=1024,
                            compute_dtype=None):
    """Transpose nn.Linear weight to (K, N), pad to tile multiples, optionally
    cast to `compute_dtype` (e.g. jnp.bfloat16 on v6e/v7x)."""
    N, K = weight.shape
    assert bias.shape == (N,)
    w_dtype = jnp.dtype(compute_dtype) if compute_dtype is not None else weight.dtype

    tn, Np = _choose_tile(N, tn_max, 128)       # lane-dense (multiples of 128)
    tk, Kp = _choose_tile(K, tk_max, 128)

    wp = _pad2d(weight.T.astype(w_dtype), Kp, Np)   # (Kp, Np)
    bp = _pad2d(bias.reshape(1, N), 1, Np)          # (1,  Np)

    return dict(N=N, K=K, tn=tn, tk=tk, Np=Np, Kp=Kp, wp=wp, bp=bp,
                compute_dtype=(jnp.dtype(compute_dtype)
                               if compute_dtype is not None else None))


# --------------------------------------------------------------------------- #
# Forward: silu(x @ weight.T + bias) using the cached params.
# --------------------------------------------------------------------------- #
def upsample_forward(x, params, *, tm_max=256):
    M, K = x.shape
    assert K == params["K"], "in_features mismatch"
    N, Np, Kp = params["N"], params["Np"], params["Kp"]
    tn, tk = params["tn"], params["tk"]
    wp, bp = params["wp"], params["bp"]

    out_dtype = x.dtype
    x_dtype = params["compute_dtype"] or x.dtype

    # Sublane alignment for M is dtype-dependent: f32 -> 8, bf16 -> 16, int8 -> 32.
    align_m = max(32 // _isz(x_dtype), 32 // _isz(out_dtype))
    tm, Mp = _choose_tile(M, tm_max, align_m)

    xp = _pad2d(x, Mp, Kp).astype(x_dtype)          # only x is padded per call

    grid_i = Mp // tm
    # v7x megacore: if both i and j collapse to one block, split j so the second
    # TensorCore gets work. Np is unchanged; only the block shape shrinks.
    if grid_i == 1 and Np // tn == 1 and tn % 256 == 0:
        tn = tn // 2
    grid = (grid_i, Np // tn, Kp // tk)

    out_is_f32 = jnp.dtype(out_dtype) == jnp.float32
    scratch_shapes = [] if out_is_f32 else [pltpu.VMEM((tm, tn), jnp.float32)]

    # VMEM budget: double-buffered x / W / bias / out tiles (+ acc scratch).
    vmem_need = (2 * tm * tk * _isz(x_dtype)
                 + 2 * tk * tn * _isz(wp.dtype)
                 + 2 * 1 * tn * _isz(bp.dtype)
                 + 2 * tm * tn * _isz(out_dtype)
                 + (0 if out_is_f32 else tm * tn * 4))
    vmem_limit = int(min(_round_up(vmem_need + (2 << 20), 1 << 20), 48 << 20))

    cost = pl.CostEstimate(
        flops=2 * Mp * Np * Kp,
        transcendentals=Mp * Np,                     # one exp per output element
        bytes_accessed=(xp.size * _isz(x_dtype) * grid[1]     # x re-read per j
                        + wp.size * _isz(wp.dtype) * grid[0]  # W re-read per i
                        + bp.size * _isz(bp.dtype) * grid[0]
                        + Mp * Np * _isz(out_dtype)),
    )

    out_padded = pl.pallas_call(
        _linear_silu_kernel,
        out_shape=jax.ShapeDtypeStruct((Mp, Np), out_dtype),
        grid_spec=pltpu.PrefetchScalarGridSpec(
            num_scalar_prefetch=0,
            grid=grid,
            in_specs=[
                pl.BlockSpec((tm, tk), lambda i, j, k: (i, k)),   # x
                pl.BlockSpec((tk, tn), lambda i, j, k: (k, j)),   # W^T (K, N)
                pl.BlockSpec((1, tn), lambda i, j, k: (0, j)),    # bias
            ],
            out_specs=pl.BlockSpec((tm, tn), lambda i, j, k: (i, j)),
            scratch_shapes=scratch_shapes,
        ),
        compiler_params=pltpu.CompilerParams(
            dimension_semantics=("parallel", "parallel", "arbitrary"),
            vmem_limit_bytes=vmem_limit,
        ),
        cost_estimate=cost,
    )(xp, wp, bp)

    if Mp == M and Np == N:
        return out_padded
    return out_padded[:M, :N]


# --------------------------------------------------------------------------- #
# Reference + tests.
# --------------------------------------------------------------------------- #
def _reference(x, weight, bias):
    y = x @ weight.T + bias
    return y * jax.nn.sigmoid(y)


def _make_linear_params(key, in_features, out_features):
    kw, kb = jax.random.split(key)
    bound = 1.0 / jnp.sqrt(in_features)
    weight = jax.random.uniform(kw, (out_features, in_features),
                                minval=-bound, maxval=bound, dtype=jnp.float32)
    bias = jax.random.uniform(kb, (out_features,),
                              minval=-bound, maxval=bound, dtype=jnp.float32)
    return weight, bias


if __name__ == "__main__":
    keys = jax.random.split(jax.random.PRNGKey(0), 8)

    # Case 1: module-sized shapes (batch=8, in_features=32, out_features=64).
    x1 = jax.random.normal(keys[0], (8, 32), dtype=jnp.float32)
    w1, b1 = _make_linear_params(keys[1], 32, 64)
    p1 = prepare_upsample_params(w1, b1)                 # one-time (cached) prep
    out1 = jax.block_until_ready(upsample_forward(x1, p1))
    ref1 = _reference(x1, w1, b1)
    assert out1.shape == (8, 64)
    assert jnp.allclose(out1, ref1, atol=1e-5, rtol=1e-5), "case 1 mismatch"

    # Case 2: non-aligned dims + forced multi-step (i, j, k) grid to exercise
    # padding, the K accumulation, and the finalize branch.
    M2, K2, N2 = 12, 300, 520
    x2 = jax.random.normal(keys[2], (M2, K2), dtype=jnp.float32)
    w2, b2 = _make_linear_params(keys[3], K2, N2)
    p2 = prepare_upsample_params(w2, b2, tn_max=128, tk_max=128)
    out2 = jax.block_until_ready(upsample_forward(x2, p2, tm_max=8))
    ref2 = _reference(x2, w2, b2)
    assert out2.shape == (M2, N2)
    assert jnp.allclose(out2, ref2, atol=1e-4, rtol=1e-5), "case 2 mismatch"

    # Case 3: multi-row-block grid with default tiles (minimal-padding tiling:
    # M=257 pads to 264, not 512).
    M3, K3, N3 = 257, 384, 512
    x3 = jax.random.normal(keys[4], (M3, K3), dtype=jnp.float32)
    w3, b3 = _make_linear_params(keys[5], K3, N3)
    p3 = prepare_upsample_params(w3, b3)
    out3 = jax.block_until_ready(upsample_forward(x3, p3))
    ref3 = _reference(x3, w3, b3)
    assert out3.shape == (M3, N3)
    assert jnp.allclose(out3, ref3, atol=1e-4, rtol=1e-5), "case 3 mismatch"

    # Case 4: small-M, wide-N path that triggers the megacore j-split.
    x4 = jax.random.normal(keys[6], (8, 128), dtype=jnp.float32)
    w4, b4 = _make_linear_params(keys[7], 128, 512)
    p4 = prepare_upsample_params(w4, b4)
    out4 = jax.block_until_ready(upsample_forward(x4, p4))
    ref4 = _reference(x4, w4, b4)
    assert out4.shape == (8, 512)
    assert jnp.allclose(out4, ref4, atol=1e-4, rtol=1e-5), "case 4 mismatch"

    print("KERNEL_OK")
</pallas_src>

<mosaic_0001>
module attributes {stable_mosaic.version = 11 : i64} {
  func.func @_linear_silu_kernel(%arg0: i32, %arg1: i32, %arg2: i32, %arg3: memref<8x128xf32, #tpu.memory_space<vmem>>, %arg4: memref<128x128xf32, #tpu.memory_space<vmem>>, %arg5: memref<1x128xf32, #tpu.memory_space<vmem>>, %arg6: memref<8x128xf32, #tpu.memory_space<vmem>>) attributes {dimension_semantics = [#tpu.dimension_semantics<parallel>, #tpu.dimension_semantics<parallel>, #tpu.dimension_semantics<arbitrary>], iteration_bounds = array<i64: 1, 1, 1>, scalar_prefetch = 0 : i64, scratch_operands = 0 : i64, tpu.core_type = #tpu.core_type<tc>, window_params = [{transform_indices = @transform_0, window_bounds = array<i64: 8, 128>}, {transform_indices = @transform_1, window_bounds = array<i64: 128, 128>}, {transform_indices = @transform_2, window_bounds = array<i64: 1, 128>}, {transform_indices = @transform_3, window_bounds = array<i64: 8, 128>}]} {
    %c0 = arith.constant 0 : index
    %c0_0 = arith.constant 0 : index
    %0 = vector.load %arg3[%c0, %c0_0] : memref<8x128xf32, #tpu.memory_space<vmem>>, vector<8x128xf32>
    %c0_1 = arith.constant 0 : index
    %c0_2 = arith.constant 0 : index
    %1 = vector.load %arg4[%c0_1, %c0_2] : memref<128x128xf32, #tpu.memory_space<vmem>>, vector<128x128xf32>
    %cst = arith.constant dense<0.000000e+00> : vector<8x128xf32>
    %2 = tpu.matmul %0, %1, %cst {dimension_numbers = #tpu.dot_dimension_numbers<[1], [0], [0], [1], [0, 0, 1, 1], [], []>} : vector<8x128xf32>, vector<128x128xf32>, vector<8x128xf32> -> vector<8x128xf32>
    %c0_i32 = arith.constant 0 : i32
    %3 = arith.cmpi eq, %arg2, %c0_i32 : i32
    %4 = arith.extui %3 : i1 to i32
    %c0_i32_3 = arith.constant 0 : i32
    %5 = arith.cmpi ne, %4, %c0_i32_3 : i32
    scf.if %5 {
      %c0_8 = arith.constant 0 : index
      %c0_9 = arith.constant 0 : index
      %12 = vector.load %arg6[%c0_8, %c0_9] : memref<8x128xf32, #tpu.memory_space<vmem>>, vector<8x128xf32>
      tpu.vector_store %arg6[%c0_8, %c0_9], %2 {strides = array<i32>} : memref<8x128xf32, #tpu.memory_space<vmem>>, vector<8x128xf32>,
    } else {
    }
    %c0_i32_4 = arith.constant 0 : i32
    %6 = arith.cmpi ne, %arg2, %c0_i32_4 : i32
    %7 = arith.extui %6 : i1 to i32
    %c0_i32_5 = arith.constant 0 : i32
    %8 = arith.cmpi ne, %7, %c0_i32_5 : i32
    scf.if %8 {
      %c0_8 = arith.constant 0 : index
      %c0_9 = arith.constant 0 : index
      %12 = vector.load %arg6[%c0_8, %c0_9] : memref<8x128xf32, #tpu.memory_space<vmem>>, vector<8x128xf32>
      %13 = arith.addf %12, %2 : vector<8x128xf32>
      %c0_10 = arith.constant 0 : index
      %c0_11 = arith.constant 0 : index
      %14 = vector.load %arg6[%c0_10, %c0_11] : memref<8x128xf32, #tpu.memory_space<vmem>>, vector<8x128xf32>
      tpu.vector_store %arg6[%c0_10, %c0_11], %13 {strides = array<i32>} : memref<8x128xf32, #tpu.memory_space<vmem>>, vector<8x128xf32>,
    } else {
    }
    %c0_i32_6 = arith.constant 0 : i32
    %9 = arith.cmpi eq, %arg2, %c0_i32_6 : i32
    %10 = arith.extui %9 : i1 to i32
    %c0_i32_7 = arith.constant 0 : i32
    %11 = arith.cmpi ne, %10, %c0_i32_7 : i32
    scf.if %11 {
      %c0_8 = arith.constant 0 : index
      %c0_9 = arith.constant 0 : index
      %12 = vector.load %arg6[%c0_8, %c0_9] : memref<8x128xf32, #tpu.memory_space<vmem>>, vector<8x128xf32>
      %c0_10 = arith.constant 0 : index
      %c0_11 = arith.constant 0 : index
      %13 = vector.load %arg5[%c0_10, %c0_11] : memref<1x128xf32, #tpu.memory_space<vmem>>, vector<1x128xf32>
      %14 = vector.broadcast %13 : vector<1x128xf32> to vector<8x128xf32>
      %15 = arith.addf %12, %14 : vector<8x128xf32>
      %cst_12 = arith.constant 0.000000e+00 : f32
      %16 = vector.broadcast %cst_12 : f32 to vector<8x128xf32>
      %17 = arith.subf %16, %15 : vector<8x128xf32>
      %18 = math.exp %17 : vector<8x128xf32>
      %cst_13 = arith.constant 1.000000e+00 : f32
      %19 = vector.broadcast %cst_13 : f32 to vector<8x128xf32>
      %20 = arith.addf %19, %18 : vector<8x128xf32>
      %cst_14 = arith.constant 1.000000e+00 : f32
      %21 = vector.broadcast %cst_14 : f32 to vector<8x128xf32>
      %22 = arith.divf %21, %20 : vector<8x128xf32>
      %23 = arith.mulf %15, %22 : vector<8x128xf32>
      %c0_15 = arith.constant 0 : index
      %c0_16 = arith.constant 0 : index
      %24 = vector.load %arg6[%c0_15, %c0_16] : memref<8x128xf32, #tpu.memory_space<vmem>>, vector<8x128xf32>
      tpu.vector_store %arg6[%c0_15, %c0_16], %23 {strides = array<i32>} : memref<8x128xf32, #tpu.memory_space<vmem>>, vector<8x128xf32>,
    } else {
    }
    return
  }
  func.func @transform_0(%arg0: i32, %arg1: i32, %arg2: i32) -> (i32, i32) {
    %c0_i32 = arith.constant 0 : i32
    return %arg0, %arg2 : i32, i32
  }
  func.func @transform_1(%arg0: i32, %arg1: i32, %arg2: i32) -> (i32, i32) {
    %c0_i32 = arith.constant 0 : i32
    return %arg2, %arg1 : i32, i32
  }
  func.func @transform_2(%arg0: i32, %arg1: i32, %arg2: i32) -> (i32, i32) {
    %c0_i32 = arith.constant 0 : i32
    %c0_i32_0 = arith.constant 0 : i32
    return %c0_i32, %arg1 : i32, i32
  }
  func.func @transform_3(%arg0: i32, %arg1: i32, %arg2: i32) -> (i32, i32) {
    %c0_i32 = arith.constant 0 : i32
    return %arg0, %arg1 : i32, i32
  }
}

</mosaic_0001>

<bundles_post_ra>
// kernel: tpu_custom_call.1
= control target key start
LH: loop header
LB: loop body
LE: loop exit
PB: predicated region body
PF: predicated region fallthrough
CT: control target
= control target key end

     0   :  { %8 = vsyncpa [#allocation3], 0  ;;  %s345_s0 = inlined_call_operand.hbm [shape: f32[8,128], index: 0, kind: input, shape index: {}]   ;;  %s346_s1 = inlined_call_operand.hbm [shape: f32[128,128], index: 1, kind: input, shape index: {}]   ;;  %s347_s2 = inlined_call_operand.vmem [shape: f32[1,128], index: 2, kind: input, shape index: {}]   ;;  %s348_s3 = inlined_call_operand.hbm [shape: f32[8,128], index: 3, kind: output, shape index: {}]  }
   0x1   :  { %9 = vsyncpa [#allocation6], 0 }
   0x2   :  { %10 = vsyncpa [#allocation4], 0  ;;  %s306_s12 = smov [#allocation2]   ;;  %s307_s14 = smov [#allocation5]  }
   0x3   :  { %s17_s13 = sshll.u32 %s306_s12, 4  ;;  %s26_s15 = sshll.u32 %s307_s14, 4  ;;  %s18_s13 = int_to_ptr.vmem [resolvable:$true] %s17_s13  ;;  %s27_s15 = int_to_ptr.vmem [resolvable:$true] %s26_s15 }
   0x4   :  { %s248_s16 = scalar_lea.vmem %s18_s13, 128  ;;  %p253_p1 = scmp.lt.s32.totalorder %s18_s13, %s18_s13 }
   0x5   :  { %p249_p0 = scmp.ne.s32.totalorder %s18_s13, %s248_s16  ;;  %p254_p2 = scmp.lt.s32.totalorder %s248_s16, %s248_s16 }
   0x7   :  { %p255_p3 = por %p254_p2, %p253_p1 }
   0x9   :  { %p256_p4 = pnand %p255_p3, %p249_p0 }
   0xb   :  { %259 = shalt.err (!%p256_p4)
}
   0xc   :  { %20 = dma.hbm_to_vmem [thread:$0]  %s345_s0, 128, %s18_s13, [#allocation3]  }
   0xd   :  { %s268_s19 = scalar_lea.vmem %s27_s15, 2048  ;;  %p273_p6 = scmp.lt.s32.totalorder %s27_s15, %s27_s15 }
   0xe   :  { %p269_p5 = scmp.ne.s32.totalorder %s27_s15, %s268_s19  ;;  %p274_p7 = scmp.lt.s32.totalorder %s268_s19, %s268_s19 }
  0x10   :  { %p275_p8 = por %p274_p7, %p273_p6 }
  0x12   :  { %p276_p9 = pnand %p275_p8, %p269_p5 }
  0x14   :  { %279 = shalt.err (!%p276_p9)
}
  0x15   :  { %s308_s20 = smov 128   ;;  %s309_s21 = smov 8  }
  0x16   :  { %32 = dma.hbm_to_vmem [thread:$0]  %s346_s1, 2048, %s27_s15, [#allocation6], %s308_s20, %s308_s20, %s309_s21  }
  0x17   :  { %300 = dma.done.wait [#allocation3], 128  }
  0x18   :  { %301 = vsyncadd [#allocation3], 4294967168 }
  0x19   :  { %302 = dma.done.wait [#allocation6], 2048  }
  0x1a   :  { %303 = vsyncadd [#allocation6], 4294965248  ;;  %v310_v0 = vmov 0.0   ;;  %vm311_vm0 = vmmov 0   ;;  %v57_v1 = vld [vmem:[#allocation5 + $0x78] sm:$0xff]  ;;  %v56_v2 = vld [vmem:[#allocation5 + $0x70] sm:$0xff] }
  0x1b   :  { %194 = vmatprep.subr.mxu0 %v310_v0  ;;  %226 = vmatprep.mubr.msk.f32.mxu0 %vm311_vm0, %v310_v0  ;;  %v55_v3 = vld [vmem:[#allocation5 + $0x68] sm:$0xff]  ;;  %v54_v4 = vld [vmem:[#allocation5 + $0x60] sm:$0xff]  ;;  %v53_v5 = vld [vmem:[#allocation5 + $0x58] sm:$0xff]  ;;  %s312_s24 = smov [#allocation7]  }
  0x1c   :  { %195 = vmatpush3.msra.mxu0 %v57_v1  ;;  %v52_v6 = vld [vmem:[#allocation5 + $0x50] sm:$0xff]  ;;  %v51_v7 = vld [vmem:[#allocation5 + $0x48] sm:$0xff]  ;;  %v50_v8 = vld [vmem:[#allocation5 + $0x40] sm:$0xff]  ;;  %s166_s25 = sshll.u32 %s312_s24, 4  ;;  %s167_s25 = int_to_ptr.vmem [resolvable:$true] %s166_s25 }
  0x1d   :  { %196 = vmatprep.subr.mxu0 %v310_v0  ;;  %v49_v9 = vld [vmem:[#allocation5 + $0x38] sm:$0xff]  ;;  %v48_v10 = vld [vmem:[#allocation5 + $0x30] sm:$0xff]  ;;  %v47_v11 = vld [vmem:[#allocation5 + $0x28] sm:$0xff]  ;;  %s280_s26 = scalar_lea.vmem %s167_s25, 128  ;;  %p285_p11 = scmp.lt.s32.totalorder %s167_s25, %s167_s25 }
  0x1e   :  { %197 = vmatpush3.msra.mxu0 %v56_v2  ;;  %v46_v12 = vld [vmem:[#allocation5 + $0x20] sm:$0xff]  ;;  %v45_v13 = vld [vmem:[#allocation5 + $0x18] sm:$0xff]  ;;  %v44_v14 = vld [vmem:[#allocation5 + $0x10] sm:$0xff]  ;;  %p281_p10 = scmp.ne.s32.totalorder %s167_s25, %s280_s26  ;;  %p286_p12 = scmp.lt.s32.totalorder %s280_s26, %s280_s26 }
  0x1f   :  { %198 = vmatprep.subr.mxu0 %v310_v0  ;;  %v43_v15 = vld [vmem:[#allocation5 + $0x8] sm:$0xff]  ;;  %v42_v16 = vld [vmem:[#allocation5] sm:$0xff]  ;;  %v41_v17 = vld [vmem:[#allocation2] sm:$0xff] }
  0x20   :  { %199 = vmatpush3.msra.mxu0 %v55_v3  ;;  %v176_v18 = vld [vmem:[%s347_s2] ss:$0 sm:$0xff]  ;;  %p287_p13 = por %p286_p12, %p285_p11 }
  0x21   :  { %200 = vmatprep.subr.mxu0 %v310_v0 }
  0x22   :  { %201 = vmatpush3.msra.mxu0 %v54_v4  ;;  %p288_p0 = pnand %p287_p13, %p281_p10 }
  0x23   :  { %202 = vmatprep.subr.mxu0 %v310_v0 }
  0x24   :  { %203 = vmatpush3.msra.mxu0 %v53_v5 }
  0x25   :  { %204 = vmatprep.subr.mxu0 %v310_v0 }
  0x26   :  { %205 = vmatpush3.msra.mxu0 %v52_v6 }
  0x27   :  { %206 = vmatprep.subr.mxu0 %v310_v0 }
  0x28   :  { %207 = vmatpush3.msra.mxu0 %v51_v7 }
  0x29   :  { %208 = vmatprep.subr.mxu0 %v310_v0 }
  0x2a   :  { %209 = vmatpush3.msra.mxu0 %v50_v8 }
  0x2b   :  { %210 = vmatprep.subr.mxu0 %v310_v0 }
  0x2c   :  { %211 = vmatpush3.msra.mxu0 %v49_v9 }
  0x2d   :  { %212 = vmatprep.subr.mxu0 %v310_v0 }
  0x2e   :  { %213 = vmatpush3.msra.mxu0 %v48_v10 }
  0x2f   :  { %214 = vmatprep.subr.mxu0 %v310_v0 }
  0x30   :  { %215 = vmatpush3.msra.mxu0 %v47_v11 }
  0x31   :  { %216 = vmatprep.subr.mxu0 %v310_v0 }
  0x32   :  { %217 = vmatpush3.msra.mxu0 %v46_v12 }
  0x33   :  { %218 = vmatprep.subr.mxu0 %v310_v0 }
  0x34   :  { %219 = vmatpush3.msra.mxu0 %v45_v13 }
  0x35   :  { %220 = vmatprep.subr.mxu0 %v310_v0 }
  0x36   :  { %221 = vmatpush3.msra.mxu0 %v44_v14 }
  0x37   :  { %222 = vmatprep.subr.mxu0 %v310_v0 }
  0x38   :  { %223 = vmatpush3.msra.mxu0 %v43_v15 }
  0x39   :  { %224 = vmatprep.subr.mxu0 %v310_v0 }
  0x3a   :  { %225 = vmatpush3.msra.mxu0 %v42_v16 }
  0x3b   :  { %227 = vmatmul.mubr.f32.vlgmr.msra.gmra.mxu0 %v41_v17 }
  0xfb   :  { %v124_v19 = vpop.f32.mrf.mxu0 }
  0xfc   :  { %v151_v20 = vadd.f32 %v176_v18, %v124_v19 }
  0xfd   :  { %v228_v21 = vpop.f32.mrf.mxu0 }
  0xfe   :  { %v152_v22 = vsub.f32 0.0, %v151_v20 }
 0x100   :  { %v153_v23 = vmul.f32 1.442695, %v152_v22 }
 0x102   :  { %236 = vpow2.f32 %v153_v23 }
 0x10f   :  { %v237_v24 = vpop.eup %236 }
 0x110   :  { %v155_v25 = vadd.f32 1.0, %v237_v24 }
 0x112   :  { %238 = vrcp.f32 %v155_v25 }
 0x11f   :  { %v239_v26 = vpop.eup %238 }
 0x120   :  { %v158_v27 = vmul.f32 %v239_v26, %v151_v20 }
 0x122   :  { %159 = vst [vmem:[#allocation7] sm:$0xff] %v158_v27 }
 0x123   :  { %291 = shalt.err (!%p288_p0)
}
 0x124   :  { %169 = dma.vmem_to_hbm [thread:$0]  %s167_s25, 128, %s348_s3, [#allocation4]  }
 0x125   :  { %304 = dma.done.wait [#allocation4], 128  }
 0x126   :  { %305 = vsyncadd [#allocation4], 4294967168 }
 0x127   :  { %173 = vsyncpa [#allocation3], 1 }
 0x128   :  { %174 = vsyncpa [#allocation6], 1 }
 0x129   :  { %175 = vsyncpa [#allocation4], 1 }

</bundles_post_ra>
